<compile_context>
chip_gen: v7x
topology: tpu7x:2x2x1
jax: 0.10.0
libtpu: 0.0.40
codegen_flags: <defaults>
</compile_context>

<pallas_src>
import jax
import jax.numpy as jnp
from jax.experimental import pallas as pl
from jax.experimental.pallas import tpu as pltpu


_VMEM_SIZING_BUDGET = 40 * 1024 * 1024   # tile-sizing budget, safe on v7x (64 MiB VMEM)
_VMEM_LIMIT_BYTES = 48 * 1024 * 1024     # explicit scoped-VMEM limit for Mosaic


def _round_up(x, m):
    return ((x + m - 1) // m) * m


def binary_classifier_kernel(x_ref, w1t_ref, b1_ref, w2_ref, b2_ref, o_ref):
    # x_ref  : (TB, IN)  input tile (original dtype, pipelined/double-buffered)
    # w1t_ref: (IN, H)   fc1.weight.T, bf16, VMEM-resident (single buffer)
    # b1_ref : (1, H)    fc1.bias, f32, VMEM-resident
    # w2_ref : (1, H)    fc2.weight, f32, VMEM-resident
    # b2_ref : (1, 1)    fc2.bias, f32, SMEM scalar
    # o_ref  : (TB, 1)   sigmoid probabilities
    x_bf = x_ref[...].astype(jnp.bfloat16)            # in-register cast, no HBM cost
    # fc1 on the MXU: (TB, IN) @ (IN, H) -> (TB, H), bf16 operands, f32 accumulate.
    h = jnp.dot(x_bf, w1t_ref[...], preferred_element_type=jnp.float32)
    h = jnp.maximum(h + b1_ref[...], 0.0)             # bias + ReLU on the VPU
    # fc2 (N == 1): VPU multiply + cross-lane reduction (XLU) instead of a
    # 1-lane-wide MXU matmul.
    logits = jnp.sum(h * w2_ref[...], axis=1, keepdims=True) + b2_ref[0, 0]  # (TB, 1)
    # sigmoid on the EUP slot (exp + approx reciprocal).
    o_ref[...] = pl.reciprocal(1.0 + jnp.exp(-logits), approx=True).astype(o_ref.dtype)


def _choose_block_b(B, IN, x_itemsize, resident_bytes):
    """Pick the number of batch rows per grid step."""
    if B <= 128:
        # Single tile covering the whole batch: block dims == array dims, so the
        # (8,128) constraint is satisfied and no batch padding is needed.
        return B
    avail = max(_VMEM_SIZING_BUDGET - resident_bytes, 1 << 20)
    # Per batch row: double-buffered x tile + double-buffered (lane-padded) out tile.
    per_row = 2 * IN * x_itemsize + 2 * 128 * 4
    cap = max(128, min(1024, (avail // per_row) // 128 * 128))
    # Keep >= 2 grid blocks when the batch allows it, so the "parallel" axis can
    # shard across both TensorCores on v7x.
    two_way = _round_up(pl.cdiv(B, 2), 128)
    return int(min(cap, two_way))


def binary_classifier(x, w1, b1, w2, b2):
    """Forward pass of BinaryClassifier.

    x : [B, input_size]               (any float dtype; cast to bf16 in-kernel)
    w1: [hidden, input_size]   == torch fc1.weight
    b1: [hidden]               == torch fc1.bias
    w2: [1, hidden]            == torch fc2.weight
    b2: [1]                    == torch fc2.bias
    Returns sigmoid probabilities [B, 1] (float32).
    """
    B, IN = x.shape
    H = w1.shape[0]

    # One-time weight prep (cheap; in practice weights would be stored this way).
    # Keeping IN/H un-padded is exact; pad them to multiples of 8/128 here if a
    # real config has awkward sizes, to avoid per-vreg padding waste in the MXU feed.
    w1t = jnp.asarray(w1, jnp.float32).T.astype(jnp.bfloat16)    # (IN, H) bf16
    b1_row = jnp.asarray(b1, jnp.float32).reshape(1, H)          # (1, H)
    w2_row = jnp.asarray(w2, jnp.float32).reshape(1, H)          # (1, H)
    b2_s = jnp.asarray(b2, jnp.float32).reshape(1, 1)            # (1, 1) -> SMEM

    # Rough single-buffered residency of the weights (for tile sizing only).
    resident_bytes = IN * H * 2 + 2 * 8 * _round_up(H, 128) * 4 + 4096
    block_b = _choose_block_b(B, IN, x.dtype.itemsize, resident_bytes)
    num_blocks = pl.cdiv(B, block_b)
    b_pad = num_blocks * block_b

    if b_pad != B:
        # Padded rows produce finite garbage (sigmoid(relu(b1) . w2 + b2)) and are
        # sliced away below; nothing in the kernel reduces across the batch axis.
        x = jnp.pad(x, ((0, b_pad - B), (0, 0)))

    cost = pl.CostEstimate(
        flops=2 * b_pad * IN * H + 4 * b_pad * H + 4 * b_pad,
        transcendentals=2 * b_pad,                    # exp + reciprocal per row
        bytes_accessed=b_pad * IN * x.dtype.itemsize + IN * H * 2
        + (2 * H + 1) * 4 + b_pad * 4,
    )

    out = pl.pallas_call(
        binary_classifier_kernel,
        out_shape=jax.ShapeDtypeStruct((b_pad, 1), jnp.float32),
        grid=(num_blocks,),
        in_specs=[
            # x: pipelined batch tiles (double-buffered by the BlockSpec pipeline).
            pl.BlockSpec((block_b, IN), lambda i: (i, 0)),
            # Weights/biases: whole-array, single-buffered VMEM residents.
            pl.BlockSpec(memory_space=pltpu.MemorySpace.VMEM),   # w1t
            pl.BlockSpec(memory_space=pltpu.MemorySpace.VMEM),   # b1
            pl.BlockSpec(memory_space=pltpu.MemorySpace.VMEM),   # w2
            pl.BlockSpec(memory_space=pltpu.MemorySpace.SMEM),   # b2 scalar
        ],
        out_specs=pl.BlockSpec((block_b, 1), lambda i: (i, 0)),
        compiler_params=pltpu.CompilerParams(
            dimension_semantics=("parallel",),
            vmem_limit_bytes=_VMEM_LIMIT_BYTES,
        ),
        cost_estimate=cost,
    )(x, w1t, b1_row, w2_row, b2_s)

    return out[:B]


def init_params(key, input_size, hidden_size):
    """Deterministic init mimicking torch.nn.Linear defaults (uniform +-1/sqrt(fan_in))."""
    k1, k2, k3, k4 = jax.random.split(key, 4)
    bound1 = 1.0 / (input_size ** 0.5)
    bound2 = 1.0 / (hidden_size ** 0.5)
    w1 = jax.random.uniform(k1, (hidden_size, input_size), jnp.float32, -bound1, bound1)
    b1 = jax.random.uniform(k2, (hidden_size,), jnp.float32, -bound1, bound1)
    w2 = jax.random.uniform(k3, (1, hidden_size), jnp.float32, -bound2, bound2)
    b2 = jax.random.uniform(k4, (1,), jnp.float32, -bound2, bound2)
    return w1, b1, w2, b2


if __name__ == "__main__":
    batch = 8
    input_size = 32
    hidden_size = 32

    key = jax.random.PRNGKey(0)
    kx, kp = jax.random.split(key)
    x = jax.random.normal(kx, (batch, input_size), jnp.float32)
    w1, b1, w2, b2 = init_params(kp, input_size, hidden_size)

    out = jax.block_until_ready(binary_classifier(x, w1, b1, w2, b2))

    # Pure-JAX f32 reference.  The kernel uses bf16 MXU operands (f32 accumulate)
    # and an EUP approximate reciprocal in the sigmoid -> loose tolerance.
    h_ref = jnp.maximum(x @ w1.T + b1[None, :], 0.0)
    ref = jax.nn.sigmoid(h_ref @ w2.T + b2[None, :])

    assert out.shape == (batch, 1)
    assert bool(jnp.all(jnp.isfinite(out)))
    assert jnp.allclose(out, ref, atol=2e-2, rtol=2e-2)

    print("KERNEL_OK")
</pallas_src>

<mosaic_0001>
module attributes {stable_mosaic.version = 11 : i64} {
  func.func @binary_classifier_kernel(%arg0: i32, %arg1: memref<8x32xf32, #tpu.memory_space<vmem>>, %arg2: memref<32x32xbf16, #tpu.memory_space<vmem>>, %arg3: memref<1x32xf32, #tpu.memory_space<vmem>>, %arg4: memref<1x32xf32, #tpu.memory_space<vmem>>, %arg5: memref<1x1xf32, #tpu.memory_space<smem>>, %arg6: memref<8x1xf32, #tpu.memory_space<vmem>>) attributes {dimension_semantics = [#tpu.dimension_semantics<parallel>], iteration_bounds = array<i64: 1>, scalar_prefetch = 0 : i64, scratch_operands = 0 : i64, tpu.core_type = #tpu.core_type<tc>, window_params = [{transform_indices = @transform_0, window_bounds = array<i64: 8, 32>}, {pipeline_mode = #tpu.pipeline_mode<synchronous>, transform_indices = @transform_1, window_bounds = array<i64: 32, 32>}, {pipeline_mode = #tpu.pipeline_mode<synchronous>, transform_indices = @transform_2, window_bounds = array<i64: 1, 32>}, {pipeline_mode = #tpu.pipeline_mode<synchronous>, transform_indices = @transform_3, window_bounds = array<i64: 1, 32>}, {transform_indices = @transform_4, window_bounds = array<i64: 1, 1>}, {transform_indices = @transform_5, window_bounds = array<i64: 8, 1>}]} {
    %c0 = arith.constant 0 : index
    %c0_0 = arith.constant 0 : index
    %0 = vector.load %arg1[%c0, %c0_0] : memref<8x32xf32, #tpu.memory_space<vmem>>, vector<8x32xf32>
    %1 = arith.truncf %0 : vector<8x32xf32> to vector<8x32xbf16>
    %c0_1 = arith.constant 0 : index
    %c0_2 = arith.constant 0 : index
    %2 = vector.load %arg2[%c0_1, %c0_2] : memref<32x32xbf16, #tpu.memory_space<vmem>>, vector<32x32xbf16>
    %cst = arith.constant dense<0.000000e+00> : vector<8x32xf32>
    %3 = tpu.matmul %1, %2, %cst {dimension_numbers = #tpu.dot_dimension_numbers<[1], [0], [0], [1], [0, 0, 1, 1], [], []>} : vector<8x32xbf16>, vector<32x32xbf16>, vector<8x32xf32> -> vector<8x32xf32>
    %c0_3 = arith.constant 0 : index
    %c0_4 = arith.constant 0 : index
    %4 = vector.load %arg3[%c0_3, %c0_4] : memref<1x32xf32, #tpu.memory_space<vmem>>, vector<1x32xf32>
    %5 = vector.broadcast %4 : vector<1x32xf32> to vector<8x32xf32>
    %6 = arith.addf %3, %5 : vector<8x32xf32>
    %cst_5 = arith.constant 0.000000e+00 : f32
    %7 = vector.broadcast %cst_5 : f32 to vector<8x32xf32>
    %8 = arith.maximumf %6, %7 : vector<8x32xf32>
    %c0_6 = arith.constant 0 : index
    %c0_7 = arith.constant 0 : index
    %9 = vector.load %arg4[%c0_6, %c0_7] : memref<1x32xf32, #tpu.memory_space<vmem>>, vector<1x32xf32>
    %10 = vector.broadcast %9 : vector<1x32xf32> to vector<8x32xf32>
    %11 = arith.mulf %8, %10 : vector<8x32xf32>
    %cst_8 = arith.constant dense<0.000000e+00> : vector<8xf32>
    %12 = vector.multi_reduction <add>, %11, %cst_8 [1] : vector<8x32xf32> to vector<8xf32>
    %13 = vector.shape_cast %12 : vector<8xf32> to vector<8x1xf32>
    %c0_9 = arith.constant 0 : index
    %c0_10 = arith.constant 0 : index
    %14 = memref.load %arg5[%c0_9, %c0_10] : memref<1x1xf32, #tpu.memory_space<smem>>
    %15 = vector.broadcast %14 : f32 to vector<8x1xf32>
    %16 = arith.addf %13, %15 : vector<8x1xf32>
    %cst_11 = arith.constant 0.000000e+00 : f32
    %17 = vector.broadcast %cst_11 : f32 to vector<8x1xf32>
    %18 = arith.subf %17, %16 : vector<8x1xf32>
    %19 = math.exp %18 : vector<8x1xf32>
    %cst_12 = arith.constant 1.000000e+00 : f32
    %20 = vector.broadcast %cst_12 : f32 to vector<8x1xf32>
    %21 = arith.addf %20, %19 : vector<8x1xf32>
    %22 = tpu.reciprocal %21 {approx = true} : vector<8x1xf32> -> vector<8x1xf32>
    %c0_13 = arith.constant 0 : index
    %c0_14 = arith.constant 0 : index
    %23 = vector.load %arg6[%c0_13, %c0_14] : memref<8x1xf32, #tpu.memory_space<vmem>>, vector<8x1xf32>
    tpu.vector_store %arg6[%c0_13, %c0_14], %22 {strides = array<i32>} : memref<8x1xf32, #tpu.memory_space<vmem>>, vector<8x1xf32>,
    return
  }
  func.func @transform_0(%arg0: i32) -> (i32, i32) {
    %c0_i32 = arith.constant 0 : i32
    %c0_i32_0 = arith.constant 0 : i32
    return %arg0, %c0_i32 : i32, i32
  }
  func.func @transform_1(%arg0: i32) -> (i32, i32) {
    %c0_i32 = arith.constant 0 : i32
    %c0_i32_0 = arith.constant 0 : i32
    %c0_i32_1 = arith.constant 0 : i32
    return %c0_i32, %c0_i32_0 : i32, i32
  }
  func.func @transform_2(%arg0: i32) -> (i32, i32) {
    %c0_i32 = arith.constant 0 : i32
    %c0_i32_0 = arith.constant 0 : i32
    %c0_i32_1 = arith.constant 0 : i32
    return %c0_i32, %c0_i32_0 : i32, i32
  }
  func.func @transform_3(%arg0: i32) -> (i32, i32) {
    %c0_i32 = arith.constant 0 : i32
    %c0_i32_0 = arith.constant 0 : i32
    %c0_i32_1 = arith.constant 0 : i32
    return %c0_i32, %c0_i32_0 : i32, i32
  }
  func.func @transform_4(%arg0: i32) -> (i32, i32) {
    %c0_i32 = arith.constant 0 : i32
    %c0_i32_0 = arith.constant 0 : i32
    %c0_i32_1 = arith.constant 0 : i32
    return %c0_i32, %c0_i32_0 : i32, i32
  }
  func.func @transform_5(%arg0: i32) -> (i32, i32) {
    %c0_i32 = arith.constant 0 : i32
    %c0_i32_0 = arith.constant 0 : i32
    return %arg0, %c0_i32 : i32, i32
  }
}

</mosaic_0001>

<bundles_post_ra>
// kernel: tpu_custom_call.1
= control target key start
LH: loop header
LB: loop body
LE: loop exit
PB: predicated region body
PF: predicated region fallthrough
CT: control target
= control target key end

     0   :  { %11 = vsyncpa [#allocation4], 0  ;;  %s300_s0 = inlined_call_operand.hbm [shape: f32[8,32], index: 0, kind: input, shape index: {}]   ;;  %s301_s1 = inlined_call_operand.hbm [shape: bf16[32,32], index: 1, kind: input, shape index: {}]   ;;  %s302_s2 = inlined_call_operand.vmem [shape: f32[1,32], index: 2, kind: input, shape index: {}]   ;;  %s303_s3 = inlined_call_operand.vmem [shape: f32[1,32], index: 3, kind: input, shape index: {}]   ;;  %s304_s4 = inlined_call_operand.<no memory space> [shape: f32[1,1], index: 4, kind: input, shape index: {}]   ;;  %s305_s5 = inlined_call_operand.vmem [shape: f32[8,1], index: 5, kind: output, shape index: {}]  }
   0x1   :  { %12 = vsyncpa [#allocation6], 0  ;;  %s221_s18 = smov [#allocation3]   ;;  %s222_s20 = smov [#allocation5]  }
   0x2   :  { %s19_s19 = sshll.u32 %s221_s18, 4  ;;  %s28_s21 = sshll.u32 %s222_s20, 4  ;;  %s20_s19 = int_to_ptr.vmem [resolvable:$true] %s19_s19  ;;  %s257_s21 = int_to_ptr.vmem [resolvable:$true] %s28_s21 }
   0x3   :  { %s173_s24 = scalar_lea.hbm %s300_s0, 128 }
   0x4   :  { %p174_p0 = scmp.ne.s32.totalorder %s300_s0, %s173_s24  ;;  %p177_p1 = scmp.lt.u32.totalorder %s173_s24, %s300_s0 }
   0x6   :  { %p179_p2 = pnand %p177_p1, %p174_p0 }
   0x8   :  { %182 = shalt.err (!%p179_p2)
}
   0x9   :  { %s183_s29 = scalar_lea.vmem %s20_s19, 128  ;;  %p188_p4 = scmp.lt.s32.totalorder %s20_s19, %s20_s19 }
   0xa   :  { %p184_p3 = scmp.ne.s32.totalorder %s20_s19, %s183_s29  ;;  %p189_p5 = scmp.lt.s32.totalorder %s183_s29, %s183_s29 }
   0xc   :  { %p190_p6 = por %p189_p5, %p188_p4 }
   0xe   :  { %p191_p7 = pnand %p190_p6, %p184_p3 }
  0x10   :  { %194 = shalt.err (!%p191_p7)
}
  0x11   :  { %22 = dma.hbm_to_vmem [thread:$0]  %s300_s0, 128, %s20_s19, [#allocation4]  }
  0x12   :  { %s195_s9 = scalar_lea.hbm %s301_s1, 256 }
  0x13   :  { %p196_p8 = scmp.ne.s32.totalorder %s301_s1, %s195_s9  ;;  %p199_p9 = scmp.lt.u32.totalorder %s195_s9, %s301_s1 }
  0x15   :  { %p201_p10 = pnand %p199_p9, %p196_p8 }
  0x17   :  { %204 = shalt.err (!%p201_p10)
}
  0x18   :  { %s205_s14 = scalar_lea.vmem %s257_s21, 256  ;;  %p210_p12 = scmp.lt.s32.totalorder %s257_s21, %s257_s21 }
  0x19   :  { %p206_p11 = scmp.ne.s32.totalorder %s257_s21, %s205_s14  ;;  %p211_p13 = scmp.lt.s32.totalorder %s205_s14, %s205_s14 }
  0x1b   :  { %p212_p0 = por %p211_p13, %p210_p12 }
  0x1d   :  { %p213_p1 = pnand %p212_p0, %p206_p11 }
  0x1f   :  { %216 = shalt.err (!%p213_p1)
}
  0x20   :  { %s223_s0 = smov 64   ;;  %s224_s15 = smov 4  }
  0x21   :  { %34 = dma.hbm_to_vmem [thread:$0]  %s301_s1, 256, %s257_s21, [#allocation6], %s223_s0, %s223_s0, %s224_s15  }
  0x22   :  { %217 = dma.done.wait [#allocation4], 128  }
  0x23   :  { %218 = vsyncadd [#allocation4], 4294967168 }
  0x24   :  { %219 = dma.done.wait [#allocation6], 256  }
  0x25   :  { %220 = vsyncadd [#allocation6], 4294967040  ;;  %v225_v0 = vmov 0.0   ;;  %vm226_vm0 = vmmov 0   ;;  %v167_v1 = vld [vmem:[#allocation5] sm:$0xff]   ;;  %v168_v2 = vld [vmem:[#allocation5 + $0x8] sm:$0xff]   ;;  %v130_v15 = vstv %s304_s4 }
  0x26   :  { %153 = vmatprep.subr.bf16.mxu0 %v225_v0  ;;  %157 = vmatprep.mubr.msk.bf16.mxu0 %vm226_vm0, %v225_v0  ;;  %v48_v3 = vld [vmem:[#allocation3] sm:$0xff]  ;;  %vm73_vm1 = vcmask 261120   ;;  %vm137_vm2 = vcmask 7168  }
  0x27   :  { %154 = vmatpush3.bf16.msra.mxu0 %v167_v1  ;;  %v49_v4 = vpack.c.bf16 %v48_v3, %v48_v3  ;;  %v145_v5 = vld [vmem:[%s302_s2] ss:$0 sm:$0xff] }
  0x28   :  { %155 = vmatprep.subr.bf16.mxu0 %v225_v0  ;;  %v149_v10 = vld [vmem:[%s303_s3] ss:$0 sm:$0xff] }
  0x2b   :  { %156 = vmatpush3.bf16.msra.mxu0 %v168_v2 }
  0x2e   :  { %158 = vmatmul.mubr.msk.bf16.vlgmr.msra.gmra.mrb[0].mxu0 %vm73_vm1, %v49_v4 }
 0x101   :  { %v111_v6 = vpop.f32.mrb[0].mxu0 }
 0x102   :  { %v112_v7 = vadd.f32 %v145_v5, %v111_v6  ;;  %v159_v8 = vpop.f32.mrb[1].mxu0 }
 0x103   :  { %v114_v9 = vpop.f32.mrb[2].mxu0 }
 0x104   :  { %v117_v11 = vmax.f32 %v112_v7, 0.0  ;;  %v160_v12 = vpop.f32.mrb[3].mxu0 }
 0x106   :  { %v125_v13 = vmul.f32 %v149_v10, %v117_v11 }
 0x108   :  { %v126_v14 = vsel %vm73_vm1, %v125_v13, 0.0 }
 0x109   :  { %127 = vadd.xlane.f32.xlu0 %v126_v14 }
 0x196   :  { %v128_v16 = vpop.xlane.xlu0 %127 }
 0x197   :  { %v131_v17 = vadd.f32 %v130_v15, %v128_v16 }
 0x199   :  { %v132_v18 = vsub.f32 0.0, %v131_v17 }
 0x19b   :  { %v133_v19 = vmul.f32 1.442695, %v132_v18 }
 0x19d   :  { %169 = vpow2.f32 %v133_v19 }
 0x1a7   :  { %v170_v20 = vpop.eup %169 }
 0x1a8   :  { %v135_v21 = vadd.f32 1.0, %v170_v20 }
 0x1aa   :  { %171 = vrcp.f32 %v135_v21 }
 0x1b4   :  { %v172_v22 = vpop.eup %171 }
 0x1b5   :  { %138 = vst.msk [vmem:[%s305_s5] sm:$0xff] %vm137_vm2, %v172_v22 }
 0x1b6   :  { %143 = vsyncpa [#allocation4], 1 }
 0x1b7   :  { %144 = vsyncpa [#allocation6], 1 }

</bundles_post_ra>
